<compile_context>
chip_gen: v5e
topology: v5e:2x2
jax: 0.10.0
libtpu: 0.0.40
codegen_flags: <defaults>
</compile_context>

<pallas_src>
import functools

import jax
import jax.numpy as jnp
from jax.experimental import pallas as pl


def rnn_predictor_kernel(x_ref, wih_ref, whh_ref, brnn_ref,
                         w1_ref, b1_ref, w2_ref, b2_ref, out_ref, *, N, T):
    H = whh_ref.shape[0]
    D_in = x_ref.shape[1]
    TN = T * N

    # --- Hoisted input projection for all T steps.
    # K = D_in is tiny (2), so use VPU broadcast-FMAs instead of a wasted MXU
    # pass.  x_ref is time-major flattened: row t*N + n is (sample n, step t).
    x = x_ref[...]                                    # (T*N, D_in) f32
    wih = wih_ref[...]                                # (D_in, H)
    u = jnp.broadcast_to(brnn_ref[...], (TN, H))      # fused b_ih + b_hh
    for d in range(D_in):                             # D_in static -> unrolled FMAs
        u = u + x[:, d:d + 1] * wih[d:d + 1, :]
    u = u.reshape(T, N, H)                            # u[t] == one contiguous tile

    # --- Recurrence: statically unrolled, h carried in registers.
    # h_0 = 0, so the t=0 matmul is skipped entirely.
    whh = whh_ref[...]
    h = jnp.tanh(u[0])
    for t in range(1, T):                             # T static -> full unroll
        h = jnp.tanh(u[t]
                     + jnp.dot(h, whh, preferred_element_type=jnp.float32))

    # --- MLP predictor on the final hidden state (weights read post-loop).
    z = jnp.maximum(
        jnp.dot(h, w1_ref[...], preferred_element_type=jnp.float32) + b1_ref[...],
        0.0)
    y = jnp.dot(z, w2_ref[...], preferred_element_type=jnp.float32) + b2_ref[...]
    out_ref[...] = y.astype(out_ref.dtype)


def model_forward(ego_input, params):
    """ego_input: (N, T, ego_input) float32.  Returns (N, 2*pred_horizon)."""
    # TODO(synk): the id-based hidden-state carry-over (init_states) is
    # host-side Python bookkeeping in the PyTorch module; only the fresh
    # h_0 = 0 path of forward() is implemented here.
    N, T, D_in = ego_input.shape
    wih, whh, brnn, w1, b1, w2, b2 = params
    H = wih.shape[1]
    F = w1.shape[1]
    P2 = w2.shape[1]

    # Lane-dense output: pad the final feature dim up to a multiple of 128.
    P_pad = ((P2 + 127) // 128) * 128
    w2p = jnp.pad(w2.astype(jnp.float32), ((0, 0), (0, P_pad - P2)))
    b2p = jnp.pad(b2.astype(jnp.float32), ((0, 0), (0, P_pad - P2)))

    # Time-major flatten: row t*N + n = ego_input[n, t, :].  The (T,N,D_in)
    # transpose of a tiny array is noise in XLA and makes every per-step
    # slice in the kernel a single contiguous (N,H) tile.
    x_flat = jnp.transpose(ego_input.astype(jnp.float32),
                           (1, 0, 2)).reshape(T * N, D_in)

    full = lambda shape: pl.BlockSpec(shape, lambda: tuple(0 for _ in shape))

    out = pl.pallas_call(
        functools.partial(rnn_predictor_kernel, N=N, T=T),
        out_shape=jax.ShapeDtypeStruct((N, P_pad), jnp.float32),
        in_specs=[
            full((T * N, D_in)),   # x, time-major flattened
            full((D_in, H)),       # W_ih^T
            full((H, H)),          # W_hh^T
            full((1, H)),          # b_ih + b_hh (fused)
            full((H, F)),          # W1^T
            full((1, F)),          # b1
            full((F, P_pad)),      # W2^T (lane-padded)
            full((1, P_pad)),      # b2   (lane-padded)
        ],
        out_specs=pl.BlockSpec((N, P_pad), lambda: (0, 0)),
    )(x_flat, wih, whh, brnn, w1, b1, w2p, b2p)

    return out[:, :P2]


def make_params(key, ego_input=2, ego_rnn=128, ego_fc=64, pred_horizon=15):
    ks = jax.random.split(key, 8)
    scale = 0.1
    # Stored pre-transposed: (in_features, out_features)
    wih = scale * jax.random.normal(ks[0], (ego_input, ego_rnn), jnp.float32)
    whh = scale * jax.random.normal(ks[1], (ego_rnn, ego_rnn), jnp.float32)
    b_ih = scale * jax.random.normal(ks[2], (ego_rnn,), jnp.float32)
    b_hh = scale * jax.random.normal(ks[3], (ego_rnn,), jnp.float32)
    brnn = (b_ih + b_hh).reshape(1, ego_rnn)
    w1 = scale * jax.random.normal(ks[4], (ego_rnn, ego_fc), jnp.float32)
    b1 = (scale * jax.random.normal(ks[5], (ego_fc,), jnp.float32)).reshape(1, ego_fc)
    w2 = scale * jax.random.normal(ks[6], (ego_fc, 2 * pred_horizon), jnp.float32)
    b2 = (scale * jax.random.normal(ks[7], (2 * pred_horizon,), jnp.float32)
          ).reshape(1, 2 * pred_horizon)
    return (wih, whh, brnn, w1, b1, w2, b2)


def reference_forward(ego_input, params):
    """Pure-JAX reference for correctness checking."""
    wih, whh, brnn, w1, b1, w2, b2 = params
    N, T, _ = ego_input.shape
    h = jnp.zeros((N, wih.shape[1]), jnp.float32)
    for t in range(T):
        h = jnp.tanh(ego_input[:, t, :] @ wih + h @ whh + brnn)
    z = jnp.maximum(h @ w1 + b1, 0.0)
    return z @ w2 + b2


if __name__ == "__main__":
    key = jax.random.PRNGKey(0)
    k_x, k_p = jax.random.split(key)

    N, T, D_in = 8, 8, 2          # batch, seq len, ego_input
    ego = jax.random.normal(k_x, (N, T, D_in), jnp.float32)
    params = make_params(k_p, ego_input=D_in, ego_rnn=128, ego_fc=64, pred_horizon=15)

    out = jax.jit(model_forward)(ego, params)
    out = jax.block_until_ready(out)

    ref = reference_forward(ego, params)
    assert out.shape == (N, 30), out.shape
    assert jnp.allclose(out, ref, atol=1e-4, rtol=1e-4), "mismatch vs JAX reference"

    print("KERNEL_OK")
</pallas_src>

<mosaic_0001>
module attributes {stable_mosaic.version = 11 : i64} {
  func.func @rnn_predictor_kernel(%arg0: memref<64x2xf32, #tpu.memory_space<vmem>>, %arg1: memref<2x128xf32, #tpu.memory_space<vmem>>, %arg2: memref<128x128xf32, #tpu.memory_space<vmem>>, %arg3: memref<1x128xf32, #tpu.memory_space<vmem>>, %arg4: memref<128x64xf32, #tpu.memory_space<vmem>>, %arg5: memref<1x64xf32, #tpu.memory_space<vmem>>, %arg6: memref<64x128xf32, #tpu.memory_space<vmem>>, %arg7: memref<1x128xf32, #tpu.memory_space<vmem>>, %arg8: memref<8x128xf32, #tpu.memory_space<vmem>>) attributes {dimension_semantics = [], scalar_prefetch = 0 : i64, scratch_operands = 0 : i64, tpu.core_type = #tpu.core_type<tc>} {
    %c0 = arith.constant 0 : index
    %c0_0 = arith.constant 0 : index
    %0 = vector.load %arg0[%c0, %c0_0] : memref<64x2xf32, #tpu.memory_space<vmem>>, vector<64x2xf32>
    %c0_1 = arith.constant 0 : index
    %c0_2 = arith.constant 0 : index
    %1 = vector.load %arg1[%c0_1, %c0_2] : memref<2x128xf32, #tpu.memory_space<vmem>>, vector<2x128xf32>
    %c0_3 = arith.constant 0 : index
    %c0_4 = arith.constant 0 : index
    %2 = vector.load %arg3[%c0_3, %c0_4] : memref<1x128xf32, #tpu.memory_space<vmem>>, vector<1x128xf32>
    %3 = vector.shape_cast %2 : vector<1x128xf32> to vector<1x128xf32>
    %4 = vector.broadcast %3 : vector<1x128xf32> to vector<64x128xf32>
    %5 = vector.extract_strided_slice %0 {offsets = [0, 0], sizes = [64, 1], strides = [1, 1]} : vector<64x2xf32> to vector<64x1xf32>
    %6 = vector.extract_strided_slice %1 {offsets = [0, 0], sizes = [1, 128], strides = [1, 1]} : vector<2x128xf32> to vector<1x128xf32>
    %7 = vector.broadcast %5 : vector<64x1xf32> to vector<64x128xf32>
    %8 = vector.broadcast %6 : vector<1x128xf32> to vector<64x128xf32>
    %9 = arith.mulf %7, %8 : vector<64x128xf32>
    %10 = arith.addf %4, %9 : vector<64x128xf32>
    %11 = vector.extract_strided_slice %0 {offsets = [0, 1], sizes = [64, 1], strides = [1, 1]} : vector<64x2xf32> to vector<64x1xf32>
    %12 = vector.extract_strided_slice %1 {offsets = [1, 0], sizes = [1, 128], strides = [1, 1]} : vector<2x128xf32> to vector<1x128xf32>
    %13 = vector.broadcast %11 : vector<64x1xf32> to vector<64x128xf32>
    %14 = vector.broadcast %12 : vector<1x128xf32> to vector<64x128xf32>
    %15 = arith.mulf %13, %14 : vector<64x128xf32>
    %16 = arith.addf %10, %15 : vector<64x128xf32>
    %17 = vector.shape_cast %16 : vector<64x128xf32> to vector<8x8x128xf32>
    %c0_5 = arith.constant 0 : index
    %c0_6 = arith.constant 0 : index
    %18 = vector.load %arg2[%c0_5, %c0_6] : memref<128x128xf32, #tpu.memory_space<vmem>>, vector<128x128xf32>
    %19 = vector.extract_strided_slice %17 {offsets = [0, 0, 0], sizes = [1, 8, 128], strides = [1, 1, 1]} : vector<8x8x128xf32> to vector<1x8x128xf32>
    %20 = vector.shape_cast %19 : vector<1x8x128xf32> to vector<8x128xf32>
    %21 = math.tanh %20 : vector<8x128xf32>
    %22 = vector.extract_strided_slice %17 {offsets = [1, 0, 0], sizes = [1, 8, 128], strides = [1, 1, 1]} : vector<8x8x128xf32> to vector<1x8x128xf32>
    %23 = vector.shape_cast %22 : vector<1x8x128xf32> to vector<8x128xf32>
    %cst = arith.constant dense<0.000000e+00> : vector<8x128xf32>
    %24 = tpu.matmul %21, %18, %cst {dimension_numbers = #tpu.dot_dimension_numbers<[1], [0], [0], [1], [0, 0, 1, 1], [], []>} : vector<8x128xf32>, vector<128x128xf32>, vector<8x128xf32> -> vector<8x128xf32>
    %25 = arith.addf %23, %24 : vector<8x128xf32>
    %26 = math.tanh %25 : vector<8x128xf32>
    %27 = vector.extract_strided_slice %17 {offsets = [2, 0, 0], sizes = [1, 8, 128], strides = [1, 1, 1]} : vector<8x8x128xf32> to vector<1x8x128xf32>
    %28 = vector.shape_cast %27 : vector<1x8x128xf32> to vector<8x128xf32>
    %cst_7 = arith.constant dense<0.000000e+00> : vector<8x128xf32>
    %29 = tpu.matmul %26, %18, %cst_7 {dimension_numbers = #tpu.dot_dimension_numbers<[1], [0], [0], [1], [0, 0, 1, 1], [], []>} : vector<8x128xf32>, vector<128x128xf32>, vector<8x128xf32> -> vector<8x128xf32>
    %30 = arith.addf %28, %29 : vector<8x128xf32>
    %31 = math.tanh %30 : vector<8x128xf32>
    %32 = vector.extract_strided_slice %17 {offsets = [3, 0, 0], sizes = [1, 8, 128], strides = [1, 1, 1]} : vector<8x8x128xf32> to vector<1x8x128xf32>
    %33 = vector.shape_cast %32 : vector<1x8x128xf32> to vector<8x128xf32>
    %cst_8 = arith.constant dense<0.000000e+00> : vector<8x128xf32>
    %34 = tpu.matmul %31, %18, %cst_8 {dimension_numbers = #tpu.dot_dimension_numbers<[1], [0], [0], [1], [0, 0, 1, 1], [], []>} : vector<8x128xf32>, vector<128x128xf32>, vector<8x128xf32> -> vector<8x128xf32>
    %35 = arith.addf %33, %34 : vector<8x128xf32>
    %36 = math.tanh %35 : vector<8x128xf32>
    %37 = vector.extract_strided_slice %17 {offsets = [4, 0, 0], sizes = [1, 8, 128], strides = [1, 1, 1]} : vector<8x8x128xf32> to vector<1x8x128xf32>
    %38 = vector.shape_cast %37 : vector<1x8x128xf32> to vector<8x128xf32>
    %cst_9 = arith.constant dense<0.000000e+00> : vector<8x128xf32>
    %39 = tpu.matmul %36, %18, %cst_9 {dimension_numbers = #tpu.dot_dimension_numbers<[1], [0], [0], [1], [0, 0, 1, 1], [], []>} : vector<8x128xf32>, vector<128x128xf32>, vector<8x128xf32> -> vector<8x128xf32>
    %40 = arith.addf %38, %39 : vector<8x128xf32>
    %41 = math.tanh %40 : vector<8x128xf32>
    %42 = vector.extract_strided_slice %17 {offsets = [5, 0, 0], sizes = [1, 8, 128], strides = [1, 1, 1]} : vector<8x8x128xf32> to vector<1x8x128xf32>
    %43 = vector.shape_cast %42 : vector<1x8x128xf32> to vector<8x128xf32>
    %cst_10 = arith.constant dense<0.000000e+00> : vector<8x128xf32>
    %44 = tpu.matmul %41, %18, %cst_10 {dimension_numbers = #tpu.dot_dimension_numbers<[1], [0], [0], [1], [0, 0, 1, 1], [], []>} : vector<8x128xf32>, vector<128x128xf32>, vector<8x128xf32> -> vector<8x128xf32>
    %45 = arith.addf %43, %44 : vector<8x128xf32>
    %46 = math.tanh %45 : vector<8x128xf32>
    %47 = vector.extract_strided_slice %17 {offsets = [6, 0, 0], sizes = [1, 8, 128], strides = [1, 1, 1]} : vector<8x8x128xf32> to vector<1x8x128xf32>
    %48 = vector.shape_cast %47 : vector<1x8x128xf32> to vector<8x128xf32>
    %cst_11 = arith.constant dense<0.000000e+00> : vector<8x128xf32>
    %49 = tpu.matmul %46, %18, %cst_11 {dimension_numbers = #tpu.dot_dimension_numbers<[1], [0], [0], [1], [0, 0, 1, 1], [], []>} : vector<8x128xf32>, vector<128x128xf32>, vector<8x128xf32> -> vector<8x128xf32>
    %50 = arith.addf %48, %49 : vector<8x128xf32>
    %51 = math.tanh %50 : vector<8x128xf32>
    %52 = vector.extract_strided_slice %17 {offsets = [7, 0, 0], sizes = [1, 8, 128], strides = [1, 1, 1]} : vector<8x8x128xf32> to vector<1x8x128xf32>
    %53 = vector.shape_cast %52 : vector<1x8x128xf32> to vector<8x128xf32>
    %cst_12 = arith.constant dense<0.000000e+00> : vector<8x128xf32>
    %54 = tpu.matmul %51, %18, %cst_12 {dimension_numbers = #tpu.dot_dimension_numbers<[1], [0], [0], [1], [0, 0, 1, 1], [], []>} : vector<8x128xf32>, vector<128x128xf32>, vector<8x128xf32> -> vector<8x128xf32>
    %55 = arith.addf %53, %54 : vector<8x128xf32>
    %56 = math.tanh %55 : vector<8x128xf32>
    %c0_13 = arith.constant 0 : index
    %c0_14 = arith.constant 0 : index
    %57 = vector.load %arg4[%c0_13, %c0_14] : memref<128x64xf32, #tpu.memory_space<vmem>>, vector<128x64xf32>
    %cst_15 = arith.constant dense<0.000000e+00> : vector<8x64xf32>
    %58 = tpu.matmul %56, %57, %cst_15 {dimension_numbers = #tpu.dot_dimension_numbers<[1], [0], [0], [1], [0, 0, 1, 1], [], []>} : vector<8x128xf32>, vector<128x64xf32>, vector<8x64xf32> -> vector<8x64xf32>
    %c0_16 = arith.constant 0 : index
    %c0_17 = arith.constant 0 : index
    %59 = vector.load %arg5[%c0_16, %c0_17] : memref<1x64xf32, #tpu.memory_space<vmem>>, vector<1x64xf32>
    %60 = vector.broadcast %59 : vector<1x64xf32> to vector<8x64xf32>
    %61 = arith.addf %58, %60 : vector<8x64xf32>
    %cst_18 = arith.constant 0.000000e+00 : f32
    %62 = vector.broadcast %cst_18 : f32 to vector<8x64xf32>
    %63 = arith.maximumf %61, %62 : vector<8x64xf32>
    %c0_19 = arith.constant 0 : index
    %c0_20 = arith.constant 0 : index
    %64 = vector.load %arg6[%c0_19, %c0_20] : memref<64x128xf32, #tpu.memory_space<vmem>>, vector<64x128xf32>
    %cst_21 = arith.constant dense<0.000000e+00> : vector<8x128xf32>
    %65 = tpu.matmul %63, %64, %cst_21 {dimension_numbers = #tpu.dot_dimension_numbers<[1], [0], [0], [1], [0, 0, 1, 1], [], []>} : vector<8x64xf32>, vector<64x128xf32>, vector<8x128xf32> -> vector<8x128xf32>
    %c0_22 = arith.constant 0 : index
    %c0_23 = arith.constant 0 : index
    %66 = vector.load %arg7[%c0_22, %c0_23] : memref<1x128xf32, #tpu.memory_space<vmem>>, vector<1x128xf32>
    %67 = vector.broadcast %66 : vector<1x128xf32> to vector<8x128xf32>
    %68 = arith.addf %65, %67 : vector<8x128xf32>
    %c0_24 = arith.constant 0 : index
    %c0_25 = arith.constant 0 : index
    %69 = vector.load %arg8[%c0_24, %c0_25] : memref<8x128xf32, #tpu.memory_space<vmem>>, vector<8x128xf32>
    tpu.vector_store %arg8[%c0_24, %c0_25], %68 {strides = array<i32>} : memref<8x128xf32, #tpu.memory_space<vmem>>, vector<8x128xf32>,
    return
  }
}

</mosaic_0001>

<bundles_post_ra>
// kernel: model_forward.1
= control target key start
LH: loop header
LB: loop body
LE: loop exit
PB: predicated region body
PF: predicated region fallthrough
CT: control target
= control target key end

     0   :  { %v476_v3 = vmov 0   ;;  %s870_s0 = inlined_call_operand.vmem [shape: f32[64,2], index: 0, kind: input, shape index: {}]   ;;  %s871_s1 = inlined_call_operand.vmem [shape: f32[2,128], index: 1, kind: input, shape index: {}]   ;;  %s872_s2 = inlined_call_operand.vmem [shape: f32[128,128], index: 2, kind: input, shape index: {}]   ;;  %s873_s3 = inlined_call_operand.vmem [shape: f32[1,128], index: 3, kind: input, shape index: {}]   ;;  %s874_s4 = inlined_call_operand.vmem [shape: f32[128,64], index: 4, kind: input, shape index: {}]   ;;  %s875_s5 = inlined_call_operand.vmem [shape: f32[1,64], index: 5, kind: input, shape index: {}]   ;;  %s876_s6 = inlined_call_operand.vmem [shape: f32[64,128], index: 6, kind: input, shape index: {}]   ;;  %s877_s7 = inlined_call_operand.vmem [shape: f32[1,128], index: 7, kind: input, shape index: {}]   ;;  %s878_s8 = inlined_call_operand.hbm [shape: f32[8,128], index: 8, kind: output, shape index: {}]  }
   0x1   :  { %v30_v0 = vld [vmem:[%s870_s0] sm:$0xff]  ;;  %v530_v1 = vld [vmem:[%s872_s2 + $0x78] sm:$0xff]  ;;  %v535_v2 = vld [vmem:[%s872_s2 + $0x70] sm:$0xff]  ;;  %418 = vset.pattern.permute.xlu0 %v476_v3  ;;  %420 = vset.pattern.permute.xlu1 %v476_v3 }
   0x2   :  { %166 = vmatpush.msra.mxu0 %v530_v1  ;;  %45 = vperm.xlu0 %418, %v30_v0   ;;  %v542_v4 = vld [vmem:[%s872_s2 + $0x68] sm:$0xff]  ;;  %v550_v5 = vld [vmem:[%s872_s2 + $0x60] sm:$0xff] }
   0x3   :  { %188 = vmatpush.msra.mxu1 %v530_v1  ;;  %422 = vset.pattern.permute.xlu2 %v476_v3 }
   0x4   :  { %167 = vmatpush.msra.mxu0 %v535_v2  ;;  %210 = vmatpush.msra.mxu2 %v530_v1 }
   0x5   :  { %13 = vsyncpa [#allocation3], 0  ;;  %189 = vmatpush.msra.mxu1 %v535_v2  ;;  %v559_v6 = vld [vmem:[%s872_s2 + $0x58] sm:$0xff]  ;;  %232 = vmatpush.msra.mxu3 %v530_v1  ;;  %v568_v7 = vld [vmem:[%s872_s2 + $0x50] sm:$0xff]  ;;  %v477_v8 = vmov 1   ;;  %vm373_vm0 = vcmask 523264  }
   0x6   :  { %168 = vmatpush.msra.mxu0 %v542_v4  ;;  %211 = vmatpush.msra.mxu2 %v535_v2  ;;  %v589_v9 = vld [vmem:[%s872_s2 + $0x48] sm:$0xff]  ;;  %v596_v10 = vld [vmem:[%s872_s2 + $0x40] sm:$0xff]  ;;  %v601_v11 = vld [vmem:[%s872_s2 + $0x38] sm:$0xff]  ;;  %s478_s9 = smov [#allocation2]  }
   0x7   :  { %190 = vmatpush.msra.mxu1 %v542_v4  ;;  %233 = vmatpush.msra.mxu3 %v535_v2  ;;  %v610_v12 = vld [vmem:[%s872_s2 + $0x30] sm:$0xff]  ;;  %v623_v13 = vld [vmem:[%s872_s2 + $0x28] sm:$0xff]  ;;  %v632_v14 = vld [vmem:[%s872_s2 + $0x20] sm:$0xff]  ;;  %s403_s10 = sshll.u32 %s478_s9, 4  ;;  %s404_s10 = int_to_ptr.vmem [resolvable:$true] %s403_s10 }
   0x8   :  { %169 = vmatpush.msra.mxu0 %v550_v5  ;;  %212 = vmatpush.msra.mxu2 %v542_v4  ;;  %v31_v15 = vld [vmem:[%s870_s0 + $0x8] sm:$0xff]  ;;  %v643_v16 = vld [vmem:[%s872_s2 + $0x18] sm:$0xff]  ;;  %v651_v17 = vld [vmem:[%s872_s2 + $0x10] sm:$0xff] }
   0x9   :  { %191 = vmatpush.msra.mxu1 %v550_v5  ;;  %234 = vmatpush.msra.mxu3 %v542_v4  ;;  %v657_v18 = vld [vmem:[%s872_s2 + $0x8] sm:$0xff]  ;;  %v666_v19 = vld [vmem:[%s872_s2] sm:$0xff]  ;;  %v33_v31 = vld [vmem:[%s870_s0 + $0x18] sm:$0xff] }
   0xa   :  { %170 = vmatpush.msra.mxu0 %v559_v6  ;;  %419 = vset.pattern.permute.xlu0 %v477_v8  ;;  %v38_v20 = vld [vmem:[%s871_s1] sm:$0x3]  ;;  %v32_v32 = vld [vmem:[%s870_s0 + $0x10] sm:$0xff]  ;;  %v35_v52 = vld [vmem:[%s870_s0 + $0x28] sm:$0xff] }
   0xb   :  { %213 = vmatpush.msra.mxu2 %v550_v5  ;;  %101 = vperm.xlu0 %419, %v30_v0   ;;  %v700_v22 = vperm.slane %v38_v20, 0  ;;  %v711_v23 = vld [vmem:[%s873_s3] ss:$0 sm:$0xff]  ;;  %v714_v25 = vperm.slane %v38_v20, 1  ;;  %v36_v62 = vld [vmem:[%s870_s0 + $0x30] sm:$0xff]  ;;  %v333_v20 = vld [vmem:[%s874_s4 + $0x68] sm:$0xff] }
   0xc   :  { %171 = vmatpush.msra.mxu0 %v568_v7  ;;  %192 = vmatpush.msra.mxu1 %v559_v6  ;;  %v34_v51 = vld [vmem:[%s870_s0 + $0x20] sm:$0xff] }
   0xd   :  { %214 = vmatpush.msra.mxu2 %v559_v6  ;;  %235 = vmatpush.msra.mxu3 %v550_v5 }
   0xe   :  { %193 = vmatpush.msra.mxu1 %v568_v7  ;;  %172 = vmatpush.msra.mxu0 %v589_v9 }
   0xf   :  { %215 = vmatpush.msra.mxu2 %v568_v7  ;;  %236 = vmatpush.msra.mxu3 %v559_v6 }
  0x10   :  { %194 = vmatpush.msra.mxu1 %v589_v9  ;;  %173 = vmatpush.msra.mxu0 %v596_v10 }
  0x11   :  { %237 = vmatpush.msra.mxu3 %v568_v7  ;;  %216 = vmatpush.msra.mxu2 %v589_v9 }
  0x12   :  { %195 = vmatpush.msra.mxu1 %v596_v10  ;;  %174 = vmatpush.msra.mxu0 %v601_v11 }
  0x13   :  { %425 = vset.pattern.permute.xlu0 %v476_v3  ;;  %238 = vmatpush.msra.mxu3 %v589_v9 }
  0x14   :  { %217 = vmatpush.msra.mxu2 %v596_v10  ;;  %196 = vmatpush.msra.mxu1 %v601_v11 }
  0x15   :  { %239 = vmatpush.msra.mxu3 %v596_v10  ;;  %175 = vmatpush.msra.mxu0 %v610_v12 }
  0x16   :  { %218 = vmatpush.msra.mxu2 %v601_v11  ;;  %197 = vmatpush.msra.mxu1 %v610_v12 }
  0x17   :  { %240 = vmatpush.msra.mxu3 %v601_v11  ;;  %176 = vmatpush.msra.mxu0 %v623_v13 }
  0x18   :  { %219 = vmatpush.msra.mxu2 %v610_v12  ;;  %198 = vmatpush.msra.mxu1 %v623_v13 }
  0x19   :  { %241 = vmatpush.msra.mxu3 %v610_v12  ;;  %177 = vmatpush.msra.mxu0 %v632_v14 }
  0x1a   :  { %220 = vmatpush.msra.mxu2 %v623_v13  ;;  %50 = vperm.xlu1 %420, %v31_v15  }
  0x1b   :  { %242 = vmatpush.msra.mxu3 %v623_v13  ;;  %199 = vmatpush.msra.mxu1 %v632_v14 }
  0x1c   :  { %221 = vmatpush.msra.mxu2 %v632_v14  ;;  %178 = vmatpush.msra.mxu0 %v643_v16 }
  0x1d   :  { %243 = vmatpush.msra.mxu3 %v632_v14  ;;  %200 = vmatpush.msra.mxu1 %v643_v16 }
  0x1e   :  { %222 = vmatpush.msra.mxu2 %v643_v16  ;;  %179 = vmatpush.msra.mxu0 %v651_v17 }
  0x1f   :  { %244 = vmatpush.msra.mxu3 %v643_v16  ;;  %201 = vmatpush.msra.mxu1 %v651_v17 }
  0x20   :  { %223 = vmatpush.msra.mxu2 %v651_v17  ;;  %180 = vmatpush.msra.mxu0 %v657_v18 }
  0x21   :  { %245 = vmatpush.msra.mxu3 %v651_v17  ;;  %202 = vmatpush.msra.mxu1 %v657_v18 }
  0x22   :  { %224 = vmatpush.msra.mxu2 %v657_v18  ;;  %181 = vmatpush.msra.mxu0 %v666_v19 }
  0x23   :  { %421 = vset.pattern.permute.xlu1 %v477_v8  ;;  %203 = vmatpush.msra.mxu1 %v666_v19 }
  0x24   :  { %105 = vperm.xlu1 %421, %v31_v15   ;;  %225 = vmatpush.msra.mxu2 %v666_v19 }
  0x25   :  { %246 = vmatpush.msra.mxu3 %v657_v18  ;;  %254 = vmatpush.msrb.mxu0 %v530_v1 }
  0x26   :  { %276 = vmatpush.msrb.mxu1 %v530_v1  ;;  %298 = vmatpush.msrb.mxu2 %v530_v1 }
  0x27   :  { %247 = vmatpush.msra.mxu3 %v666_v19  ;;  %255 = vmatpush.msrb.mxu0 %v535_v2 }
  0x28   :  { %277 = vmatpush.msrb.mxu1 %v535_v2  ;;  %299 = vmatpush.msrb.mxu2 %v535_v2 }
  0x29   :  { %256 = vmatpush.msrb.mxu0 %v542_v4  ;;  %55 = vperm.xlu2 %422, %v32_v32  }
  0x2a   :  { %278 = vmatpush.msrb.mxu1 %v542_v4  ;;  %300 = vmatpush.msrb.mxu2 %v542_v4 }
  0x2b   :  { %257 = vmatpush.msrb.mxu0 %v550_v5  ;;  %65 = vperm.xlu0 %425, %v34_v51  }
  0x2c   :  { %424 = vset.pattern.permute.xlu1 %v476_v3  ;;  %279 = vmatpush.msrb.mxu1 %v550_v5 }
  0x2d   :  { %301 = vmatpush.msrb.mxu2 %v550_v5  ;;  %258 = vmatpush.msrb.mxu0 %v559_v6 }
  0x2e   :  { %280 = vmatpush.msrb.mxu1 %v559_v6  ;;  %60 = vperm.xlu1 %424, %v33_v31  }
  0x2f   :  { %302 = vmatpush.msrb.mxu2 %v559_v6  ;;  %259 = vmatpush.msrb.mxu0 %v568_v7 }
  0x30   :  { %281 = vmatpush.msrb.mxu1 %v568_v7 }
  0x31   :  { %303 = vmatpush.msrb.mxu2 %v568_v7  ;;  %260 = vmatpush.msrb.mxu0 %v589_v9 }
  0x32   :  { %282 = vmatpush.msrb.mxu1 %v589_v9  ;;  %423 = vset.pattern.permute.xlu2 %v477_v8 }
  0x33   :  { %304 = vmatpush.msrb.mxu2 %v589_v9  ;;  %261 = vmatpush.msrb.mxu0 %v596_v10 }
  0x34   :  { %283 = vmatpush.msrb.mxu1 %v596_v10  ;;  %109 = vperm.xlu2 %423, %v32_v32  }
  0x35   :  { %305 = vmatpush.msrb.mxu2 %v596_v10  ;;  %262 = vmatpush.msrb.mxu0 %v601_v11 }
  0x36   :  { %284 = vmatpush.msrb.mxu1 %v601_v11  ;;  %426 = vset.pattern.permute.xlu1 %v477_v8 }
  0x37   :  { %306 = vmatpush.msrb.mxu2 %v601_v11  ;;  %263 = vmatpush.msrb.mxu0 %v610_v12 }
  0x38   :  { %285 = vmatpush.msrb.mxu1 %v610_v12  ;;  %117 = vperm.xlu1 %426, %v34_v51  }
  0x39   :  { %307 = vmatpush.msrb.mxu2 %v610_v12  ;;  %264 = vmatpush.msrb.mxu0 %v623_v13 }
  0x3a   :  { %286 = vmatpush.msrb.mxu1 %v623_v13  ;;  %428 = vset.pattern.permute.xlu0 %v477_v8 }
  0x3b   :  { %308 = vmatpush.msrb.mxu2 %v623_v13  ;;  %265 = vmatpush.msrb.mxu0 %v632_v14 }
  0x3c   :  { %287 = vmatpush.msrb.mxu1 %v632_v14  ;;  %113 = vperm.xlu2 %423, %v33_v31  }
  0x3d   :  { %309 = vmatpush.msrb.mxu2 %v632_v14  ;;  %266 = vmatpush.msrb.mxu0 %v643_v16 }
  0x3e   :  { %288 = vmatpush.msrb.mxu1 %v643_v16  ;;  %125 = vperm.xlu0 %428, %v36_v62  }
  0x3f   :  { %310 = vmatpush.msrb.mxu2 %v643_v16  ;;  %267 = vmatpush.msrb.mxu0 %v651_v17 }
  0x40   :  { %289 = vmatpush.msrb.mxu1 %v651_v17  ;;  %121 = vperm.xlu1 %426, %v35_v52  }
  0x41   :  { %311 = vmatpush.msrb.mxu2 %v651_v17  ;;  %268 = vmatpush.msrb.mxu0 %v657_v18  ;;  %v37_v17 = vld [vmem:[%s870_s0 + $0x38] sm:$0xff] }
  0x42   :  { %290 = vmatpush.msrb.mxu1 %v657_v18 }
  0x43   :  { %312 = vmatpush.msrb.mxu2 %v657_v18  ;;  %269 = vmatpush.msrb.mxu0 %v666_v19  ;;  %v335_v18 = vld [vmem:[%s874_s4 + $0x78] sm:$0xff] }
  0x44   :  { %291 = vmatpush.msrb.mxu1 %v666_v19  ;;  %427 = vset.pattern.permute.xlu2 %v476_v3 }
  0x45   :  { %313 = vmatpush.msrb.mxu2 %v666_v19  ;;  %70 = vperm.xlu2 %427, %v35_v52   ;;  %v334_v19 = vld [vmem:[%s874_s4 + $0x70] sm:$0xff] }
  0x46   :  { %340 = vmatpush.msrb.mxu3 %v335_v18 }
  0x48   :  { %429 = vset.pattern.permute.xlu1 %v476_v3  ;;  %341 = vmatpush.msrb.mxu3 %v334_v19 }
  0x49   :  { %80 = vperm.xlu1 %429, %v37_v17  }
  0x4a   :  { %342 = vmatpush.msrb.mxu3 %v333_v20 }
  0x4d   :  { %75 = vperm.xlu2 %427, %v36_v62  }
  0x55   :  { %430 = vset.pattern.permute.xlu2 %v477_v8 }
  0x56   :  { %129 = vperm.xlu2 %430, %v37_v17  }
  0x74   :  { %v46_v21 = vpop.permute.xlu0 %45 }
  0x75   :  { %v84_v24 = vmul.f32 %v700_v22, %v46_v21  ;;  %v332_v21 = vld [vmem:[%s874_s4 + $0x60] sm:$0xff] }
  0x76   :  { %343 = vmatpush.msrb.mxu3 %v332_v21 }
  0x77   :  { %v92_v27 = vadd.f32 %v711_v23, %v84_v24  ;;  %v331_v24 = vld [vmem:[%s874_s4 + $0x58] sm:$0xff] }
  0x78   :  { %344 = vmatpush.msrb.mxu3 %v331_v24 }
  0x7d   :  { %v102_v26 = vpop.permute.xlu0 %101 }
  0x7e   :  { %v133_v28 = vmul.f32 %v714_v25, %v102_v26  ;;  %v330_v26 = vld [vmem:[%s874_s4 + $0x50] sm:$0xff] }
  0x7f   :  { %345 = vmatpush.msrb.mxu3 %v330_v26 }
  0x80   :  { %v141_v29 = vadd.f32 %v133_v28, %v92_v27  ;;  %v329_v28 = vld [vmem:[%s874_s4 + $0x48] sm:$0xff] }
  0x81   :  { %346 = vmatpush.msrb.mxu3 %v329_v28 }
  0x82   :  { %434 = vtanh.f32 %v141_v29 }
  0x83   :  { %v56_v42 = vpop.permute.xlu2 %55 }
  0x84   :  { %v86_v43 = vmul.f32 %v700_v22, %v56_v42  ;;  %v323_v42 = vld [vmem:[%s874_s4 + $0x18] sm:$0xff] }
  0x86   :  { %v94_v45 = vadd.f32 %v711_v23, %v86_v43  ;;  %v322_v43 = vld [vmem:[%s874_s4 + $0x10] sm:$0xff] }
  0x88   :  { %v435_v30 = vpop.eup %434 }
  0x89   :  { %182 = vmatmul.f32.vlgmr.msra.gmra.mxu0 %v435_v30  ;;  %v328_v30 = vld [vmem:[%s874_s4 + $0x40] sm:$0xff] }
  0x8a   :  { %347 = vmatpush.msrb.mxu3 %v328_v30 }
  0x8c   :  { %v51_v33 = vpop.permute.xlu1 %50 }
  0x8d   :  { %v85_v34 = vmul.f32 %v700_v22, %v51_v33 }
  0x8e   :  { %v110_v44 = vpop.permute.xlu2 %109 }
  0x8f   :  { %v93_v36 = vadd.f32 %v711_v23, %v85_v34  ;;  %v135_v46 = vmul.f32 %v714_v25, %v110_v44  ;;  %v321_v44 = vld [vmem:[%s874_s4 + $0x8] sm:$0xff] }
  0x91   :  { %v143_v47 = vadd.f32 %v135_v46, %v94_v45  ;;  %v320_v45 = vld [vmem:[%s874_s4] sm:$0xff]  ;;  %v368_v46 = vld [vmem:[%s876_s6 + $0x38] sm:$0xff] }
  0x92   :  { %385 = vmatpush.msra.mxu0 %v368_v46 }
  0x96   :  { %v106_v35 = vpop.permute.xlu1 %105  ;;  %v114_v55 = vpop.permute.xlu2 %113 }
  0x97   :  { %v134_v37 = vmul.f32 %v714_v25, %v106_v35  ;;  %v136_v57 = vmul.f32 %v714_v25, %v114_v55 }
  0x99   :  { %v142_v38 = vadd.f32 %v134_v37, %v93_v36 }
  0x9d   :  { %v66_v63 = vpop.permute.xlu0 %65 }
  0x9e   :  { %v88_v0 = vmul.f32 %v700_v22, %v66_v63 }
  0x9f   :  { %v71_v9 = vpop.permute.xlu2 %70 }
  0xa0   :  { %v61_v53 = vpop.permute.xlu1 %60  ;;  %v96_v3 = vadd.f32 %v711_v23, %v88_v0  ;;  %v89_v10 = vmul.f32 %v700_v22, %v71_v9  ;;  %v433_v0 = vld [vmem:[%s877_s7] ss:$0 sm:$0xff] }
  0xa1   :  { %v87_v54 = vmul.f32 %v700_v22, %v61_v53 }
  0xa2   :  { %v97_v12 = vadd.f32 %v711_v23, %v89_v10 }
  0xa3   :  { %v95_v56 = vadd.f32 %v711_v23, %v87_v54 }
  0xa5   :  { %v144_v58 = vadd.f32 %v136_v57, %v95_v56 }
  0xa7   :  { %v76_v27 = vpop.permute.xlu2 %75 }
  0xa8   :  { %v90_v29 = vmul.f32 %v700_v22, %v76_v27 }
  0xaa   :  { %v118_v1 = vpop.permute.xlu1 %117  ;;  %v98_v32 = vadd.f32 %v711_v23, %v90_v29 }
  0xab   :  { %v137_v2 = vmul.f32 %v714_v25, %v118_v1 }
  0xad   :  { %v145_v4 = vadd.f32 %v137_v2, %v96_v3 }
  0xb0   :  { %v126_v31 = vpop.permute.xlu0 %125  ;;  %v130_v53 = vpop.permute.xlu2 %129 }
  0xb1   :  { %v139_v33 = vmul.f32 %v714_v25, %v126_v31  ;;  %v140_v55 = vmul.f32 %v714_v25, %v130_v53 }
  0xb2   :  { %v122_v11 = vpop.permute.xlu1 %121 }
  0xb3   :  { %v138_v8 = vmul.f32 %v714_v25, %v122_v11  ;;  %v147_v34 = vadd.f32 %v139_v33, %v98_v32  ;;  %v432_v25 = vld [vmem:[%s875_s5] ss:$0 sm:$0xff] }
  0xb5   :  { %v146_v13 = vadd.f32 %v138_v8, %v97_v12 }
  0xbb   :  { %v81_v51 = vpop.permute.xlu1 %80 }
  0xbc   :  { %v91_v52 = vmul.f32 %v700_v22, %v81_v51  ;;  %v362_v22 = vld [vmem:[%s876_s6 + $0x8] sm:$0xff] }
  0xbe   :  { %v99_v54 = vadd.f32 %v711_v23, %v91_v52  ;;  %v361_v23 = vld [vmem:[%s876_s6] sm:$0xff] }
  0xc0   :  { %v148_v56 = vadd.f32 %v140_v55, %v99_v54 }
 0x106   :  { %v183_v39 = vpop.f32.mrf.mxu0 }
 0x107   :  { %v186_v40 = vadd.f32 %v183_v39, %v142_v38  ;;  %v327_v38 = vld [vmem:[%s874_s4 + $0x38] sm:$0xff]  ;;  %v326_v39 = vld [vmem:[%s874_s4 + $0x30] sm:$0xff] }
 0x108   :  { %348 = vmatpush.msrb.mxu3 %v327_v38 }
 0x109   :  { %436 = vtanh.f32 %v186_v40  ;;  %v325_v40 = vld [vmem:[%s874_s4 + $0x28] sm:$0xff] }
 0x10a   :  { %349 = vmatpush.msrb.mxu3 %v326_v39 }
 0x10c   :  { %350 = vmatpush.msrb.mxu3 %v325_v40 }
 0x10f   :  { %v437_v41 = vpop.eup %436 }
 0x110   :  { %204 = vmatmul.f32.vlgmr.msra.gmra.mxu1 %v437_v41  ;;  %v324_v41 = vld [vmem:[%s874_s4 + $0x20] sm:$0xff] }
 0x111   :  { %351 = vmatpush.msrb.mxu3 %v324_v41 }
 0x113   :  { %352 = vmatpush.msrb.mxu3 %v323_v42 }
 0x115   :  { %353 = vmatpush.msrb.mxu3 %v322_v43 }
 0x117   :  { %354 = vmatpush.msrb.mxu3 %v321_v44 }
 0x119   :  { %355 = vmatpush.msrb.mxu3 %v320_v45 }
 0x18d   :  { %v205_v48 = vpop.f32.mrf.mxu1 }
 0x18e   :  { %v208_v49 = vadd.f32 %v205_v48, %v143_v47  ;;  %v367_v47 = vld [vmem:[%s876_s6 + $0x30] sm:$0xff]  ;;  %v366_v48 = vld [vmem:[%s876_s6 + $0x28] sm:$0xff] }
 0x18f   :  { %386 = vmatpush.msra.mxu0 %v367_v47 }
 0x190   :  { %438 = vtanh.f32 %v208_v49  ;;  %v365_v49 = vld [vmem:[%s876_s6 + $0x20] sm:$0xff] }
 0x191   :  { %387 = vmatpush.msra.mxu0 %v366_v48 }
 0x193   :  { %388 = vmatpush.msra.mxu0 %v365_v49 }
 0x196   :  { %v439_v50 = vpop.eup %438 }
 0x197   :  { %226 = vmatmul.f32.vlgmr.msra.gmra.mxu2 %v439_v50  ;;  %v364_v50 = vld [vmem:[%s876_s6 + $0x18] sm:$0xff] }
 0x198   :  { %389 = vmatpush.msra.mxu0 %v364_v50 }
 0x21a   :  { %v227_v59 = vpop.f32.mrf.mxu2 }
 0x21b   :  { %v230_v60 = vadd.f32 %v227_v59, %v144_v58 }
 0x21d   :  { %440 = vtanh.f32 %v230_v60  ;;  %v363_v60 = vld [vmem:[%s876_s6 + $0x10] sm:$0xff]  ;;  %s405_s6 = sshll.u32 %s878_s8, 4  ;;  %s406_s6 = int_to_ptr.hbm [resolvable:$true] %s405_s6 }
 0x21e   :  { %390 = vmatpush.msra.mxu0 %v363_v60 }
 0x220   :  { %391 = vmatpush.msra.mxu0 %v362_v22 }
 0x222   :  { %392 = vmatpush.msra.mxu0 %v361_v23 }
 0x223   :  { %v441_v61 = vpop.eup %440 }
 0x224   :  { %248 = vmatmul.f32.vlgmr.msra.gmra.mxu3 %v441_v61 }
 0x2a7   :  { %v249_v5 = vpop.f32.mrf.mxu3 }
 0x2a8   :  { %v252_v6 = vadd.f32 %v249_v5, %v145_v4 }
 0x2aa   :  { %442 = vtanh.f32 %v252_v6 }
 0x2b0   :  { %v443_v7 = vpop.eup %442 }
 0x2b1   :  { %270 = vmatmul.f32.vlgmr.msrb.gmra.mxu0 %v443_v7 }
 0x32e   :  { %v271_v14 = vpop.f32.mrf.mxu0 }
 0x32f   :  { %v274_v15 = vadd.f32 %v271_v14, %v146_v13 }
 0x331   :  { %444 = vtanh.f32 %v274_v15 }
 0x337   :  { %v445_v16 = vpop.eup %444 }
 0x338   :  { %292 = vmatmul.f32.vlgmr.msrb.gmra.mxu1 %v445_v16 }
 0x3b5   :  { %v293_v35 = vpop.f32.mrf.mxu1 }
 0x3b6   :  { %v296_v36 = vadd.f32 %v293_v35, %v147_v34 }
 0x3b8   :  { %446 = vtanh.f32 %v296_v36 }
 0x3be   :  { %v447_v37 = vpop.eup %446 }
 0x3bf   :  { %314 = vmatmul.f32.vlgmr.msrb.gmra.mxu2 %v447_v37 }
 0x442   :  { %v315_v57 = vpop.f32.mrf.mxu2 }
 0x443   :  { %v318_v58 = vadd.f32 %v315_v57, %v148_v56 }
 0x445   :  { %448 = vtanh.f32 %v318_v58 }
 0x44b   :  { %v449_v59 = vpop.eup %448 }
 0x44c   :  { %356 = vmatmul.f32.vlgmr.msrb.gmra.mxu3 %v449_v59 }
 0x4cf   :  { %v357_v61 = vpop.f32.mrf.mxu3 }
 0x4d0   :  { %v358_v62 = vadd.f32 %v432_v25, %v357_v61 }
 0x4d2   :  { %v360_v63 = vmax.f32 %v358_v62, 0.0 }
 0x4d4   :  { %414 = vmatmul.msk.f32.vlgmr.msra.gmra.mxu0 %vm373_vm0, %v360_v63 }
 0x551   :  { %v394_v1 = vpop.f32.mrf.mxu0 }
 0x552   :  { %v395_v2 = vadd.f32 %v433_v0, %v394_v1 }
 0x554   :  { %397 = vst [vmem:[#allocation2] sm:$0xff] %v395_v2 }
 0x555   :  { %408 = dma.vmem_to_hbm [thread:$0]  %s404_s10, 128, %s406_s6, [#allocation3]  }
 0x556   :  { %474 = dma.done.wait [#allocation3], 128  }
 0x557   :  { %475 = vsyncadd [#allocation3], 4294967168 }
 0x558   :  { %413 = vsyncpa [#allocation3], 1 }

</bundles_post_ra>
